<compile_context>
chip_gen: v7x
topology: tpu7x:2x2x1
jax: 0.10.0
libtpu: 0.0.40
codegen_flags: <defaults>
</compile_context>

<pallas_src>
import jax
import jax.numpy as jnp
from jax.experimental import pallas as pl
from jax.experimental.pallas import tpu as pltpu

IN_FEATURES = 3 * 32 * 32   # 3072
OUT_FEATURES = 10
N_PAD = 128                 # lane-dense padded output width
TB_CAP = 512                # keeps f32 x double-buffer + weights < 16 MiB


def _round_up(x, m):
    return ((x + m - 1) // m) * m


def _linear_kernel(x_ref, w_ref, b_ref, o_ref):
    # x_ref: (TB, K) f32, w_ref: (K, 128) bf16, b_ref: (1, 128) f32,
    # o_ref: (TB, 128) f32.
    # Cast x -> bf16 in VMEM (VPU, cheap) so the MXU runs at bf16 rate while
    # x is only ever read from HBM once, as f32.
    x_bf = x_ref[...].astype(jnp.bfloat16)
    acc = jnp.dot(x_bf, w_ref[...], preferred_element_type=jnp.float32)
    o_ref[...] = acc + b_ref[...]


def prepare_params(w_t, b):
    """One-time param prep: w_t (3072, 10) f32, b (10,) f32 ->
    (w_pad (3072, 128) bf16, b_pad (1, 128) f32)."""
    K = IN_FEATURES
    w_pad = (
        jnp.zeros((K, N_PAD), jnp.float32)
        .at[:, :OUT_FEATURES].set(w_t)
        .astype(jnp.bfloat16)
    )
    b_pad = jnp.zeros((1, N_PAD), jnp.float32).at[0, :OUT_FEATURES].set(b)
    return w_pad, b_pad


def linear_cifar_forward(x, w_pad, b_pad):
    """x: (B, 3, 32, 32) f32, w_pad: (3072, 128) bf16, b_pad: (1, 128) f32
    -> (B, 10) f32."""
    B = x.shape[0]
    K = IN_FEATURES
    x2d = x.reshape(B, K)                    # same as torch .view(-1, 3*32*32)

    # --- batch tiling --------------------------------------------------------
    if B < 16:
        # Tiny batch: pad to one 16-row tile (bf16 sublane tile is (16, 128)).
        Bp = 16
        x2d = jnp.pad(x2d, ((0, Bp - B), (0, 0)))
    else:
        # No padding copy: ragged trailing block is handled by Pallas.
        Bp = B

    if Bp >= 32:
        # Aim for >= 2 grid steps (v7x megacore), capped at TB_CAP.
        TB = min(TB_CAP, _round_up(pl.cdiv(Bp, 2), 16))
    else:
        TB = 16
    grid = (pl.cdiv(Bp, TB),)

    cost = pl.CostEstimate(
        flops=2 * Bp * K * N_PAD,
        transcendentals=0,
        bytes_accessed=Bp * K * 4 + K * N_PAD * 2 + N_PAD * 4 + Bp * N_PAD * 4,
    )

    out_full = pl.pallas_call(
        _linear_kernel,
        out_shape=jax.ShapeDtypeStruct((Bp, N_PAD), jnp.float32),
        grid_spec=pl.GridSpec(
            grid=grid,
            in_specs=[
                pl.BlockSpec((TB, K), lambda i: (i, 0)),       # x tile (pipelined)
                pl.BlockSpec((K, N_PAD), lambda i: (0, 0)),    # weight (VMEM-resident)
                pl.BlockSpec((1, N_PAD), lambda i: (0, 0)),    # bias   (VMEM-resident)
            ],
            out_specs=pl.BlockSpec((TB, N_PAD), lambda i: (i, 0)),
        ),
        compiler_params=pltpu.CompilerParams(
            dimension_semantics=("parallel",),
            vmem_limit_bytes=32 * 1024 * 1024,
        ),
        cost_estimate=cost,
    )(x2d, w_pad, b_pad)

    return out_full[:B, :OUT_FEATURES]


def init_params(key):
    """Deterministic init mimicking nn.Linear default (uniform +/- 1/sqrt(fan_in))."""
    k_w, k_b = jax.random.split(key)
    bound = 1.0 / (IN_FEATURES ** 0.5)
    # torch stores weight as (out, in); keep that convention then transpose.
    w = jax.random.uniform(
        k_w, (OUT_FEATURES, IN_FEATURES), jnp.float32, minval=-bound, maxval=bound
    )
    b = jax.random.uniform(
        k_b, (OUT_FEATURES,), jnp.float32, minval=-bound, maxval=bound
    )
    return w.T, b  # (K, N), (N,)


if __name__ == "__main__":
    key = jax.random.PRNGKey(0)
    k_x, k_p = jax.random.split(key)

    B = 2
    x = jax.random.normal(k_x, (B, 3, 32, 32), jnp.float32)
    w_t, b = init_params(k_p)
    w_pad, b_pad = prepare_params(w_t, b)        # one-time prep, outside forward

    out = linear_cifar_forward(x, w_pad, b_pad)
    out = jax.block_until_ready(out)
    assert out.shape == (B, OUT_FEATURES)

    # Reference 1: same bf16-operand / f32-accumulate math as the kernel (tight).
    x_bf = x.reshape(B, IN_FEATURES).astype(jnp.bfloat16).astype(jnp.float32)
    w_bf = w_t.astype(jnp.bfloat16).astype(jnp.float32)
    ref_bf = x_bf @ w_bf + b[None, :]
    assert jnp.allclose(out, ref_bf, atol=1e-3, rtol=1e-3)

    # Reference 2: full-f32 torch-equivalent F.linear (loose, bf16 rounding).
    ref_f32 = x.reshape(B, IN_FEATURES) @ w_t + b[None, :]
    assert jnp.allclose(out, ref_f32, atol=2e-2, rtol=2e-2)

    print("KERNEL_OK")
</pallas_src>

<mosaic_0001>
module attributes {stable_mosaic.version = 11 : i64} {
  func.func @_linear_kernel(%arg0: i32, %arg1: memref<16x3072xf32, #tpu.memory_space<vmem>>, %arg2: memref<3072x128xbf16, #tpu.memory_space<vmem>>, %arg3: memref<1x128xf32, #tpu.memory_space<vmem>>, %arg4: memref<16x128xf32, #tpu.memory_space<vmem>>) attributes {dimension_semantics = [#tpu.dimension_semantics<parallel>], iteration_bounds = array<i64: 1>, scalar_prefetch = 0 : i64, scratch_operands = 0 : i64, tpu.core_type = #tpu.core_type<tc>, window_params = [{transform_indices = @transform_0, window_bounds = array<i64: 16, 3072>}, {pipeline_mode = #tpu.pipeline_mode<synchronous>, transform_indices = @transform_1, window_bounds = array<i64: 3072, 128>}, {pipeline_mode = #tpu.pipeline_mode<synchronous>, transform_indices = @transform_2, window_bounds = array<i64: 1, 128>}, {transform_indices = @transform_3, window_bounds = array<i64: 16, 128>}]} {
    %c0 = arith.constant 0 : index
    %c0_0 = arith.constant 0 : index
    %0 = vector.load %arg1[%c0, %c0_0] : memref<16x3072xf32, #tpu.memory_space<vmem>>, vector<16x3072xf32>
    %1 = arith.truncf %0 : vector<16x3072xf32> to vector<16x3072xbf16>
    %c0_1 = arith.constant 0 : index
    %c0_2 = arith.constant 0 : index
    %2 = vector.load %arg2[%c0_1, %c0_2] : memref<3072x128xbf16, #tpu.memory_space<vmem>>, vector<3072x128xbf16>
    %cst = arith.constant dense<0.000000e+00> : vector<16x128xf32>
    %3 = tpu.matmul %1, %2, %cst {dimension_numbers = #tpu.dot_dimension_numbers<[1], [0], [0], [1], [0, 0, 1, 1], [], []>} : vector<16x3072xbf16>, vector<3072x128xbf16>, vector<16x128xf32> -> vector<16x128xf32>
    %c0_3 = arith.constant 0 : index
    %c0_4 = arith.constant 0 : index
    %4 = vector.load %arg3[%c0_3, %c0_4] : memref<1x128xf32, #tpu.memory_space<vmem>>, vector<1x128xf32>
    %5 = vector.broadcast %4 : vector<1x128xf32> to vector<16x128xf32>
    %6 = arith.addf %3, %5 : vector<16x128xf32>
    %c0_5 = arith.constant 0 : index
    %c0_6 = arith.constant 0 : index
    %7 = vector.load %arg4[%c0_5, %c0_6] : memref<16x128xf32, #tpu.memory_space<vmem>>, vector<16x128xf32>
    tpu.vector_store %arg4[%c0_5, %c0_6], %6 {strides = array<i32>} : memref<16x128xf32, #tpu.memory_space<vmem>>, vector<16x128xf32>,
    return
  }
  func.func @transform_0(%arg0: i32) -> (i32, i32) {
    %c0_i32 = arith.constant 0 : i32
    %c0_i32_0 = arith.constant 0 : i32
    return %arg0, %c0_i32 : i32, i32
  }
  func.func @transform_1(%arg0: i32) -> (i32, i32) {
    %c0_i32 = arith.constant 0 : i32
    %c0_i32_0 = arith.constant 0 : i32
    %c0_i32_1 = arith.constant 0 : i32
    return %c0_i32, %c0_i32_0 : i32, i32
  }
  func.func @transform_2(%arg0: i32) -> (i32, i32) {
    %c0_i32 = arith.constant 0 : i32
    %c0_i32_0 = arith.constant 0 : i32
    %c0_i32_1 = arith.constant 0 : i32
    return %c0_i32, %c0_i32_0 : i32, i32
  }
  func.func @transform_3(%arg0: i32) -> (i32, i32) {
    %c0_i32 = arith.constant 0 : i32
    %c0_i32_0 = arith.constant 0 : i32
    return %arg0, %c0_i32 : i32, i32
  }
}

</mosaic_0001>

<bundles_post_ra>
// kernel: tpu_custom_call.1
= control target key start
LH: loop header
LB: loop body
LE: loop exit
PB: predicated region body
PF: predicated region fallthrough
CT: control target
= control target key end

     0   :  { %8 = vsyncpa [#allocation3], 0  ;;  %s2969_s0 = inlined_call_operand.hbm [shape: f32[16,3072], index: 0, kind: input, shape index: {}]   ;;  %s2970_s1 = inlined_call_operand.hbm [shape: bf16[3072,128], index: 1, kind: input, shape index: {}]   ;;  %s2971_s2 = inlined_call_operand.vmem [shape: f32[1,128], index: 2, kind: input, shape index: {}]   ;;  %s2972_s3 = inlined_call_operand.hbm [shape: f32[16,128], index: 3, kind: output, shape index: {}]  }
   0x1   :  { %9 = vsyncpa [#allocation6], 0 }
   0x2   :  { %10 = vsyncpa [#allocation4], 0  ;;  %s2901_s12 = smov [#allocation2]   ;;  %s2829_s16 = scalar_lea.hbm %s2969_s0, 6144 }
   0x3   :  { %s16_s13 = sshll.u32 %s2901_s12, 4  ;;  %p2830_p0 = scmp.ne.s32.totalorder %s2969_s0, %s2829_s16  ;;  %s17_s13 = int_to_ptr.vmem [resolvable:$true] %s16_s13 }
   0x4   :  { %p2833_p1 = scmp.lt.u32.totalorder %s2829_s16, %s2969_s0 }
   0x6   :  { %p2835_p2 = pnand %p2833_p1, %p2830_p0 }
   0x8   :  { %2838 = shalt.err (!%p2835_p2)
}
   0x9   :  { %s2839_s21 = scalar_lea.vmem %s17_s13, 6144  ;;  %p2844_p4 = scmp.lt.s32.totalorder %s17_s13, %s17_s13 }
   0xa   :  { %p2840_p3 = scmp.ne.s32.totalorder %s17_s13, %s2839_s21  ;;  %p2845_p5 = scmp.lt.s32.totalorder %s2839_s21, %s2839_s21 }
   0xc   :  { %p2846_p6 = por %p2845_p5, %p2844_p4 }
   0xe   :  { %p2847_p7 = pnand %p2846_p6, %p2840_p3 }
  0x10   :  { %2850 = shalt.err (!%p2847_p7)
}
  0x11   :  { %s2902_s22 = smov 3072   ;;  %s2903_s23 = smov 192  }
  0x12   :  { %22 = dma.hbm_to_vmem [thread:$0]  %s2969_s0, 6144, %s17_s13, [#allocation3], %s2902_s22, %s2902_s22, %s2903_s23  }
  0x13   :  { %s2904_s26 = smov [#allocation5]   ;;  %s2851_s30 = scalar_lea.hbm %s2970_s1, 24576 }
  0x14   :  { %s28_s27 = sshll.u32 %s2904_s26, 4  ;;  %p2852_p8 = scmp.ne.s32.totalorder %s2970_s1, %s2851_s30  ;;  %s29_s27 = int_to_ptr.vmem [resolvable:$true] %s28_s27 }
  0x15   :  { %p2855_p9 = scmp.lt.u32.totalorder %s2851_s30, %s2970_s1 }
  0x17   :  { %p2857_p10 = pnand %p2855_p9, %p2852_p8 }
  0x19   :  { %2860 = shalt.err (!%p2857_p10)
}
  0x1a   :  { %s2861_s8 = scalar_lea.vmem %s29_s27, 24576  ;;  %p2866_p12 = scmp.lt.s32.totalorder %s29_s27, %s29_s27 }
  0x1b   :  { %p2862_p11 = scmp.ne.s32.totalorder %s29_s27, %s2861_s8  ;;  %p2867_p13 = scmp.lt.s32.totalorder %s2861_s8, %s2861_s8 }
  0x1d   :  { %p2868_p0 = por %p2867_p13, %p2866_p12 }
  0x1f   :  { %p2869_p1 = pnand %p2868_p0, %p2862_p11 }
  0x21   :  { %2872 = shalt.err (!%p2869_p1)
}
  0x22   :  { %s2905_s0 = smov 64   ;;  %s2906_s9 = smov 4  }
  0x23   :  { %34 = dma.hbm_to_vmem [thread:$0]  %s2970_s1, 24576, %s29_s27, [#allocation6], %s2905_s0, %s2905_s0, %s2906_s9  }
  0x24   :  { %2895 = dma.done.wait [#allocation3], 6144  }
  0x25   :  { %2896 = vsyncadd [#allocation3], 4294961152 }
  0x26   :  { %2897 = dma.done.wait [#allocation6], 24576  }
  0x27   :  { %2898 = vsyncadd [#allocation6], 4294942720  ;;  %v2637_v0 = vld [vmem:[#allocation5 + $0x40] sm:$0xff]   ;;  %v2641_v4 = vld [vmem:[#allocation5 + $0x48] sm:$0xff]  }
  0x28   :  { %v2638_v1 = vld [vmem:[#allocation5 + $0xc0] sm:$0xff]   ;;  %2364 = vmatprep.subr.bf16.mxu0 %v2637_v0  ;;  %v2642_v5 = vld [vmem:[#allocation5 + $0xc8] sm:$0xff]   ;;  %v2645_v8 = vld [vmem:[#allocation5 + $0x50] sm:$0xff]  }
  0x29   :  { %v2639_v2 = vld [vmem:[#allocation5] sm:$0xff]   ;;  %2386 = vmatprep.subr.bf16.mxu1 %v2638_v1  ;;  %v2643_v6 = vld [vmem:[#allocation5 + $0x8] sm:$0xff]   ;;  %v2646_v9 = vld [vmem:[#allocation5 + $0xd0] sm:$0xff]  }
  0x2a   :  { %v2640_v3 = vld [vmem:[#allocation5 + $0x80] sm:$0xff]   ;;  %2365 = vmatpush3.bf16.msra.mxu0 %v2639_v2  ;;  %v2644_v7 = vld [vmem:[#allocation5 + $0x88] sm:$0xff]   ;;  %v2647_v10 = vld [vmem:[#allocation5 + $0x10] sm:$0xff]  }
  0x2b   :  { %2387 = vmatpush3.bf16.msra.mxu1 %v2640_v3  ;;  %2366 = vmatprep.subr.bf16.mxu0 %v2641_v4  ;;  %v2648_v11 = vld [vmem:[#allocation5 + $0x90] sm:$0xff]   ;;  %v2649_v12 = vld [vmem:[#allocation5 + $0x58] sm:$0xff]   ;;  %v2653_v16 = vld [vmem:[#allocation5 + $0x60] sm:$0xff]  }
  0x2c   :  { %2388 = vmatprep.subr.bf16.mxu1 %v2642_v5  ;;  %v2650_v13 = vld [vmem:[#allocation5 + $0xd8] sm:$0xff]   ;;  %v2654_v17 = vld [vmem:[#allocation5 + $0xe0] sm:$0xff]   ;;  %v2657_v20 = vld [vmem:[#allocation5 + $0x68] sm:$0xff]  }
  0x2d   :  { %v2651_v14 = vld [vmem:[#allocation5 + $0x18] sm:$0xff]   ;;  %v2655_v18 = vld [vmem:[#allocation5 + $0x20] sm:$0xff]   ;;  %v2658_v21 = vld [vmem:[#allocation5 + $0xe8] sm:$0xff]  }
  0x2e   :  { %2367 = vmatpush3.bf16.msra.mxu0 %v2643_v6  ;;  %v2652_v15 = vld [vmem:[#allocation5 + $0x98] sm:$0xff]   ;;  %v2656_v19 = vld [vmem:[#allocation5 + $0xa0] sm:$0xff]   ;;  %v2659_v22 = vld [vmem:[#allocation5 + $0x28] sm:$0xff]  }
  0x2f   :  { %2389 = vmatpush3.bf16.msra.mxu1 %v2644_v7  ;;  %2368 = vmatprep.subr.bf16.mxu0 %v2645_v8  ;;  %v2660_v23 = vld [vmem:[#allocation5 + $0xa8] sm:$0xff]   ;;  %v2661_v24 = vld [vmem:[#allocation5 + $0x70] sm:$0xff]   ;;  %v2665_v28 = vld [vmem:[#allocation5 + $0x78] sm:$0xff]  }
  0x30   :  { %2390 = vmatprep.subr.bf16.mxu1 %v2646_v9  ;;  %v2662_v25 = vld [vmem:[#allocation5 + $0xf0] sm:$0xff]   ;;  %v2666_v29 = vld [vmem:[#allocation5 + $0xf8] sm:$0xff]   ;;  %v45_v32 = vld [vmem:[#allocation2 + $0x8] sm:$0xff] }
  0x31   :  { %v2663_v26 = vld [vmem:[#allocation5 + $0x30] sm:$0xff]   ;;  %v2667_v30 = vld [vmem:[#allocation5 + $0x38] sm:$0xff]   ;;  %v69_v33 = vld [vmem:[#allocation2 + $0xc8] sm:$0xff] }
  0x32   :  { %2369 = vmatpush3.bf16.msra.mxu0 %v2647_v10  ;;  %v2664_v27 = vld [vmem:[#allocation5 + $0xb0] sm:$0xff]   ;;  %v2668_v31 = vld [vmem:[#allocation5 + $0xb8] sm:$0xff]   ;;  %v93_v35 = vpack.c.bf16 %v69_v33, %v45_v32  ;;  %v44_v37 = vld [vmem:[#allocation2] sm:$0xff] }
  0x33   :  { %2391 = vmatpush3.bf16.msra.mxu1 %v2648_v11  ;;  %2370 = vmatprep.subr.bf16.mxu0 %v2649_v12  ;;  %v47_v34 = vld [vmem:[#allocation2 + $0x18] sm:$0xff]  ;;  %v68_v38 = vld [vmem:[#allocation2 + $0xc0] sm:$0xff]  ;;  %v46_v41 = vld [vmem:[#allocation2 + $0x10] sm:$0xff] }
  0x34   :  { %2392 = vmatprep.subr.bf16.mxu1 %v2650_v13  ;;  %v71_v36 = vld [vmem:[#allocation2 + $0xd8] sm:$0xff]  ;;  %v92_v40 = vpack.c.bf16 %v68_v38, %v44_v37  ;;  %v70_v42 = vld [vmem:[#allocation2 + $0xd0] sm:$0xff]  ;;  %1691 = vmatprep.mubr.bf16.mxu0 %v93_v35  ;;  %v2669_v44 = vld [vmem:[#allocation5 + $0x140] sm:$0xff]  }
  0x35   :  { %v95_v39 = vpack.c.bf16 %v71_v36, %v47_v34  ;;  %v94_v43 = vpack.c.bf16 %v70_v42, %v46_v41  ;;  %v2670_v45 = vld [vmem:[#allocation5 + $0x1c0] sm:$0xff]   ;;  %v2673_v48 = vld [vmem:[#allocation5 + $0x148] sm:$0xff]   ;;  %v2677_v52 = vld [vmem:[#allocation5 + $0x150] sm:$0xff]  }
  0x36   :  { %2371 = vmatpush3.bf16.msra.mxu0 %v2651_v14  ;;  %v2671_v46 = vld [vmem:[#allocation5 + $0x100] sm:$0xff]   ;;  %v2674_v49 = vld [vmem:[#allocation5 + $0x1c8] sm:$0xff]   ;;  %v2678_v53 = vld [vmem:[#allocation5 + $0x1d0] sm:$0xff]  }
  0x37   :  { %2393 = vmatpush3.bf16.msra.mxu1 %v2652_v15  ;;  %2372 = vmatprep.subr.bf16.mxu0 %v2653_v16  ;;  %v2672_v47 = vld [vmem:[#allocation5 + $0x180] sm:$0xff]   ;;  %v2675_v50 = vld [vmem:[#allocation5 + $0x108] sm:$0xff]   ;;  %v2679_v54 = vld [vmem:[#allocation5 + $0x110] sm:$0xff]  }
  0x38   :  { %2394 = vmatprep.subr.bf16.mxu1 %v2654_v17  ;;  %1732 = vmatprep.mubr.bf16.mxu1 %v95_v39  ;;  %v2676_v51 = vld [vmem:[#allocation5 + $0x188] sm:$0xff]   ;;  %v2680_v55 = vld [vmem:[#allocation5 + $0x190] sm:$0xff]   ;;  %v2681_v56 = vld [vmem:[#allocation5 + $0x158] sm:$0xff]  }
  0x39   :  { %v2682_v57 = vld [vmem:[#allocation5 + $0x1d8] sm:$0xff]   ;;  %v2685_v60 = vld [vmem:[#allocation5 + $0x160] sm:$0xff]   ;;  %v2689_v0 = vld [vmem:[#allocation5 + $0x168] sm:$0xff]  }
  0x3a   :  { %2373 = vmatpush3.bf16.msra.mxu0 %v2655_v18  ;;  %v2683_v58 = vld [vmem:[#allocation5 + $0x118] sm:$0xff]   ;;  %v2686_v61 = vld [vmem:[#allocation5 + $0x1e0] sm:$0xff]   ;;  %v2690_v1 = vld [vmem:[#allocation5 + $0x1e8] sm:$0xff]  }
  0x3b   :  { %2395 = vmatpush3.bf16.msra.mxu1 %v2656_v19  ;;  %2374 = vmatprep.subr.bf16.mxu0 %v2657_v20  ;;  %v2684_v59 = vld [vmem:[#allocation5 + $0x198] sm:$0xff]   ;;  %v2687_v62 = vld [vmem:[#allocation5 + $0x120] sm:$0xff]   ;;  %v2691_v2 = vld [vmem:[#allocation5 + $0x128] sm:$0xff]  }
  0x3c   :  { %2396 = vmatprep.subr.bf16.mxu1 %v2658_v21  ;;  %v2688_v63 = vld [vmem:[#allocation5 + $0x1a0] sm:$0xff]   ;;  %v2692_v3 = vld [vmem:[#allocation5 + $0x1a8] sm:$0xff]   ;;  %v2693_v4 = vld [vmem:[#allocation5 + $0x170] sm:$0xff]  }
  0x3d   :  { %v2694_v5 = vld [vmem:[#allocation5 + $0x1f0] sm:$0xff]   ;;  %v2697_v8 = vld [vmem:[#allocation5 + $0x178] sm:$0xff]   ;;  %v49_v12 = vld [vmem:[#allocation2 + $0x28] sm:$0xff] }
  0x3e   :  { %2375 = vmatpush3.bf16.msra.mxu0 %v2659_v22  ;;  %v2695_v6 = vld [vmem:[#allocation5 + $0x130] sm:$0xff]   ;;  %v2698_v9 = vld [vmem:[#allocation5 + $0x1f8] sm:$0xff]   ;;  %v73_v13 = vld [vmem:[#allocation2 + $0xe8] sm:$0xff] }
  0x3f   :  { %2397 = vmatpush3.bf16.msra.mxu1 %v2660_v23  ;;  %2376 = vmatprep.subr.bf16.mxu0 %v2661_v24  ;;  %v2696_v7 = vld [vmem:[#allocation5 + $0x1b0] sm:$0xff]   ;;  %v2699_v10 = vld [vmem:[#allocation5 + $0x138] sm:$0xff]   ;;  %v97_v16 = vpack.c.bf16 %v73_v13, %v49_v12  ;;  %v48_v18 = vld [vmem:[#allocation2 + $0x20] sm:$0xff] }
  0x40   :  { %2398 = vmatprep.subr.bf16.mxu1 %v2662_v25  ;;  %v2700_v11 = vld [vmem:[#allocation5 + $0x1b8] sm:$0xff]   ;;  %v72_v19 = vld [vmem:[#allocation2 + $0xe0] sm:$0xff]  ;;  %v50_v20 = vld [vmem:[#allocation2 + $0x30] sm:$0xff] }
  0x41   :  { %v51_v14 = vld [vmem:[#allocation2 + $0x38] sm:$0xff]  ;;  %v96_v21 = vpack.c.bf16 %v72_v19, %v48_v18  ;;  %v74_v22 = vld [vmem:[#allocation2 + $0xf0] sm:$0xff]  ;;  %v2701_v24 = vld [vmem:[#allocation5 + $0x240] sm:$0xff]  }
  0x42   :  { %2377 = vmatpush3.bf16.msra.mxu0 %v2663_v26  ;;  %v75_v15 = vld [vmem:[#allocation2 + $0xf8] sm:$0xff]  ;;  %v98_v23 = vpack.c.bf16 %v74_v22, %v50_v20  ;;  %v2702_v25 = vld [vmem:[#allocation5 + $0x2c0] sm:$0xff]   ;;  %v2709_v32 = vld [vmem:[#allocation5 + $0x250] sm:$0xff]  }
  0x43   :  { %2399 = vmatpush3.bf16.msra.mxu1 %v2664_v27  ;;  %2378 = vmatprep.subr.bf16.mxu0 %v2665_v28  ;;  %v99_v17 = vpack.c.bf16 %v75_v15, %v51_v14  ;;  %v2703_v26 = vld [vmem:[#allocation5 + $0x200] sm:$0xff]   ;;  %v2705_v28 = vld [vmem:[#allocation5 + $0x248] sm:$0xff]   ;;  %v2710_v33 = vld [vmem:[#allocation5 + $0x2d0] sm:$0xff]  }
  0x44   :  { %2400 = vmatprep.subr.bf16.mxu1 %v2666_v29  ;;  %v2704_v27 = vld [vmem:[#allocation5 + $0x280] sm:$0xff]   ;;  %v2706_v29 = vld [vmem:[#allocation5 + $0x2c8] sm:$0xff]   ;;  %v2711_v34 = vld [vmem:[#allocation5 + $0x210] sm:$0xff]  }
  0x45   :  { %v2712_v35 = vld [vmem:[#allocation5 + $0x290] sm:$0xff]   ;;  %v2713_v36 = vld [vmem:[#allocation5 + $0x258] sm:$0xff]   ;;  %v2718_v41 = vld [vmem:[#allocation5 + $0x2e0] sm:$0xff]  }
  0x46   :  { %2379 = vmatpush3.bf16.msra.mxu0 %v2667_v30  ;;  %v2707_v30 = vld [vmem:[#allocation5 + $0x208] sm:$0xff]   ;;  %v2714_v37 = vld [vmem:[#allocation5 + $0x2d8] sm:$0xff]   ;;  %v2719_v42 = vld [vmem:[#allocation5 + $0x220] sm:$0xff]  }
  0x47   :  { %2401 = vmatpush3.bf16.msra.mxu1 %v2668_v31  ;;  %2408 = vmatprep.subr.bf16.mxu0 %v2669_v44  ;;  %v2708_v31 = vld [vmem:[#allocation5 + $0x288] sm:$0xff]   ;;  %v2715_v38 = vld [vmem:[#allocation5 + $0x218] sm:$0xff]   ;;  %v2741_v12 = vld [vmem:[#allocation5 + $0x350] sm:$0xff]  }
  0x48   :  { %2430 = vmatprep.subr.bf16.mxu1 %v2670_v45  ;;  %v2716_v39 = vld [vmem:[#allocation5 + $0x298] sm:$0xff]   ;;  %v2721_v44 = vld [vmem:[#allocation5 + $0x268] sm:$0xff]   ;;  %v2742_v13 = vld [vmem:[#allocation5 + $0x3d0] sm:$0xff]  }
  0x49   :  { %1692 = vmatmul.mubr.bf16.vlgmr.msra.gmra.mrb[0].mxu0 %v92_v40  ;;  %v2717_v40 = vld [vmem:[#allocation5 + $0x260] sm:$0xff]   ;;  %v2722_v45 = vld [vmem:[#allocation5 + $0x2e8] sm:$0xff]   ;;  %v2743_v14 = vld [vmem:[#allocation5 + $0x310] sm:$0xff]  }
  0x4a   :  { %1733 = vmatmul.mubr.bf16.vlgmr.msra.gmra.mrb[0].mxu1 %v94_v43  ;;  %2409 = vmatpush3.bf16.msra.mxu0 %v2671_v46  ;;  %v2720_v43 = vld [vmem:[#allocation5 + $0x2a0] sm:$0xff]   ;;  %v2723_v46 = vld [vmem:[#allocation5 + $0x228] sm:$0xff]   ;;  %v2744_v15 = vld [vmem:[#allocation5 + $0x390] sm:$0xff]  }
  0x4b   :  { %2431 = vmatpush3.bf16.msra.mxu1 %v2672_v47  ;;  %2410 = vmatprep.subr.bf16.mxu0 %v2673_v48  ;;  %v2724_v47 = vld [vmem:[#allocation5 + $0x2a8] sm:$0xff]   ;;  %v2725_v48 = vld [vmem:[#allocation5 + $0x270] sm:$0xff]   ;;  %v2747_v18 = vld [vmem:[#allocation5 + $0x318] sm:$0xff]  }
  0x4c   :  { %2432 = vmatprep.subr.bf16.mxu1 %v2674_v49  ;;  %1773 = vmatprep.mubr.bf16.mxu0 %v97_v16  ;;  %v2726_v49 = vld [vmem:[#allocation5 + $0x2f0] sm:$0xff]   ;;  %v2745_v16 = vld [vmem:[#allocation5 + $0x358] sm:$0xff]   ;;  %v2749_v20 = vld [vmem:[#allocation5 + $0x360] sm:$0xff]  }
  0x4d   :  { %1814 = vmatprep.mubr.bf16.mxu1 %v99_v17  ;;  %v2746_v17 = vld [vmem:[#allocation5 + $0x3d8] sm:$0xff]   ;;  %v2751_v22 = vld [vmem:[#allocation5 + $0x320] sm:$0xff]  }
  0x4e   :  { %2411 = vmatpush3.bf16.msra.mxu0 %v2675_v50  ;;  %v2727_v50 = vld [vmem:[#allocation5 + $0x230] sm:$0xff]   ;;  %v2748_v19 = vld [vmem:[#allocation5 + $0x398] sm:$0xff]  }
  0x4f   :  { %2433 = vmatpush3.bf16.msra.mxu1 %v2676_v51  ;;  %2412 = vmatprep.subr.bf16.mxu0 %v2677_v52  ;;  %v2728_v51 = vld [vmem:[#allocation5 + $0x2b0] sm:$0xff]   ;;  %v2729_v52 = vld [vmem:[#allocation5 + $0x278] sm:$0xff]  }
  0x50   :  { %2434 = vmatprep.subr.bf16.mxu1 %v2678_v53  ;;  %v2730_v53 = vld [vmem:[#allocation5 + $0x2f8] sm:$0xff]  }
  0x52   :  { %2413 = vmatpush3.bf16.msra.mxu0 %v2679_v54  ;;  %v2731_v54 = vld [vmem:[#allocation5 + $0x238] sm:$0xff]  }
  0x53   :  { %2435 = vmatpush3.bf16.msra.mxu1 %v2680_v55  ;;  %2414 = vmatprep.subr.bf16.mxu0 %v2681_v56  ;;  %v2732_v55 = vld [vmem:[#allocation5 + $0x2b8] sm:$0xff]   ;;  %v53_v56 = vld [vmem:[#allocation2 + $0x48] sm:$0xff] }
  0x54   :  { %2436 = vmatprep.subr.bf16.mxu1 %v2682_v57  ;;  %v77_v57 = vld [vmem:[#allocation2 + $0x108] sm:$0xff] }
  0x56   :  { %2415 = vmatpush3.bf16.msra.mxu0 %v2683_v58  ;;  %v101_v58 = vpack.c.bf16 %v77_v57, %v53_v56  ;;  %v2773_v56 = vld [vmem:[#allocation5 + $0x450] sm:$0xff]  }
  0x57   :  { %2437 = vmatpush3.bf16.msra.mxu1 %v2684_v59  ;;  %2416 = vmatprep.subr.bf16.mxu0 %v2685_v60  ;;  %v55_v59 = vld [vmem:[#allocation2 + $0x58] sm:$0xff]  ;;  %v2774_v57 = vld [vmem:[#allocation5 + $0x4d0] sm:$0xff]  }
  0x58   :  { %2438 = vmatprep.subr.bf16.mxu1 %v2686_v61  ;;  %v79_v60 = vld [vmem:[#allocation2 + $0x118] sm:$0xff]  ;;  %v52_v61 = vld [vmem:[#allocation2 + $0x40] sm:$0xff] }
  0x5a   :  { %2417 = vmatpush3.bf16.msra.mxu0 %v2687_v62  ;;  %v103_v62 = vpack.c.bf16 %v79_v60, %v55_v59  ;;  %v2776_v59 = vld [vmem:[#allocation5 + $0x490] sm:$0xff]   ;;  %v2777_v60 = vld [vmem:[#allocation5 + $0x458] sm:$0xff]  }
  0x5b   :  { %2439 = vmatpush3.bf16.msra.mxu1 %v2688_v63  ;;  %2418 = vmatprep.subr.bf16.mxu0 %v2689_v0  ;;  %v76_v63 = vld [vmem:[#allocation2 + $0x100] sm:$0xff]  ;;  %v54_v0 = vld [vmem:[#allocation2 + $0x50] sm:$0xff] }
  0x5c   :  { %2440 = vmatprep.subr.bf16.mxu1 %v2690_v1  ;;  %v78_v1 = vld [vmem:[#allocation2 + $0x110] sm:$0xff] }
  0x5e   :  { %2419 = vmatpush3.bf16.msra.mxu0 %v2691_v2  ;;  %v100_v2 = vpack.c.bf16 %v76_v63, %v52_v61  ;;  %v2778_v61 = vld [vmem:[#allocation5 + $0x4d8] sm:$0xff]  }
  0x5f   :  { %2441 = vmatpush3.bf16.msra.mxu1 %v2692_v3  ;;  %2420 = vmatprep.subr.bf16.mxu0 %v2693_v4  ;;  %v102_v3 = vpack.c.bf16 %v78_v1, %v54_v0  ;;  %v2733_v4 = vld [vmem:[#allocation5 + $0x340] sm:$0xff]   ;;  %v2780_v63 = vld [vmem:[#allocation5 + $0x498] sm:$0xff]  }
  0x60   :  { %2442 = vmatprep.subr.bf16.mxu1 %v2694_v5  ;;  %v2734_v5 = vld [vmem:[#allocation5 + $0x3c0] sm:$0xff]  }
  0x61   :  { %v2781_v0 = vld [vmem:[#allocation5 + $0x460] sm:$0xff]  }
  0x62   :  { %2421 = vmatpush3.bf16.msra.mxu0 %v2695_v6  ;;  %v2735_v6 = vld [vmem:[#allocation5 + $0x300] sm:$0xff]  }
  0x63   :  { %2443 = vmatpush3.bf16.msra.mxu1 %v2696_v7  ;;  %2422 = vmatprep.subr.bf16.mxu0 %v2697_v8  ;;  %v2736_v7 = vld [vmem:[#allocation5 + $0x380] sm:$0xff]   ;;  %v2737_v8 = vld [vmem:[#allocation5 + $0x348] sm:$0xff]  }
  0x64   :  { %2444 = vmatprep.subr.bf16.mxu1 %v2698_v9  ;;  %v2738_v9 = vld [vmem:[#allocation5 + $0x3c8] sm:$0xff]   ;;  %v2782_v1 = vld [vmem:[#allocation5 + $0x4e0] sm:$0xff]  }
  0x66   :  { %2423 = vmatpush3.bf16.msra.mxu0 %v2699_v10  ;;  %v2739_v10 = vld [vmem:[#allocation5 + $0x308] sm:$0xff]  }
  0x67   :  { %2445 = vmatpush3.bf16.msra.mxu1 %v2700_v11  ;;  %2452 = vmatprep.subr.bf16.mxu0 %v2701_v24  ;;  %v2740_v11 = vld [vmem:[#allocation5 + $0x388] sm:$0xff]  }
  0x68   :  { %2474 = vmatprep.subr.bf16.mxu1 %v2702_v25  ;;  %v2753_v24 = vld [vmem:[#allocation5 + $0x368] sm:$0xff]  }
  0x69   :  { %1774 = vmatmul.mubr.bf16.vlgmr.msra.gmra.mrb[4].mxu0 %v96_v21  ;;  %v2750_v21 = vld [vmem:[#allocation5 + $0x3e0] sm:$0xff]   ;;  %v2754_v25 = vld [vmem:[#allocation5 + $0x3e8] sm:$0xff]  }
  0x6a   :  { %1815 = vmatmul.mubr.bf16.vlgmr.msra.gmra.mrb[4].mxu1 %v98_v23  ;;  %2453 = vmatpush3.bf16.msra.mxu0 %v2703_v26  ;;  %v2752_v23 = vld [vmem:[#allocation5 + $0x3a0] sm:$0xff]   ;;  %v2755_v26 = vld [vmem:[#allocation5 + $0x328] sm:$0xff]  }
  0x6b   :  { %2475 = vmatpush3.bf16.msra.mxu1 %v2704_v27  ;;  %2454 = vmatprep.subr.bf16.mxu0 %v2705_v28  ;;  %v2756_v27 = vld [vmem:[#allocation5 + $0x3a8] sm:$0xff]   ;;  %v2757_v28 = vld [vmem:[#allocation5 + $0x370] sm:$0xff]  }
  0x6c   :  { %2476 = vmatprep.subr.bf16.mxu1 %v2706_v29  ;;  %1855 = vmatprep.mubr.bf16.mxu0 %v101_v58  ;;  %v2758_v29 = vld [vmem:[#allocation5 + $0x3f0] sm:$0xff]  }
  0x6d   :  { %1896 = vmatprep.mubr.bf16.mxu1 %v103_v62  ;;  %v2775_v58 = vld [vmem:[#allocation5 + $0x410] sm:$0xff]   ;;  %v2779_v62 = vld [vmem:[#allocation5 + $0x418] sm:$0xff]  }
  0x6e   :  { %2455 = vmatpush3.bf16.msra.mxu0 %v2707_v30  ;;  %v2759_v30 = vld [vmem:[#allocation5 + $0x330] sm:$0xff]  }
  0x6f   :  { %2477 = vmatpush3.bf16.msra.mxu1 %v2708_v31  ;;  %2456 = vmatprep.subr.bf16.mxu0 %v2709_v32  ;;  %v2760_v31 = vld [vmem:[#allocation5 + $0x3b0] sm:$0xff]   ;;  %v2761_v32 = vld [vmem:[#allocation5 + $0x378] sm:$0xff]  }
  0x70   :  { %2478 = vmatprep.subr.bf16.mxu1 %v2710_v33  ;;  %v2762_v33 = vld [vmem:[#allocation5 + $0x3f8] sm:$0xff]  }
  0x72   :  { %2457 = vmatpush3.bf16.msra.mxu0 %v2711_v34  ;;  %v2763_v34 = vld [vmem:[#allocation5 + $0x338] sm:$0xff]  }
  0x73   :  { %2479 = vmatpush3.bf16.msra.mxu1 %v2712_v35  ;;  %2458 = vmatprep.subr.bf16.mxu0 %v2713_v36  ;;  %v2764_v35 = vld [vmem:[#allocation5 + $0x3b8] sm:$0xff]   ;;  %v57_v36 = vld [vmem:[#allocation2 + $0x68] sm:$0xff] }
  0x74   :  { %2480 = vmatprep.subr.bf16.mxu1 %v2714_v37  ;;  %v81_v37 = vld [vmem:[#allocation2 + $0x128] sm:$0xff] }
  0x76   :  { %2459 = vmatpush3.bf16.msra.mxu0 %v2715_v38  ;;  %v59_v38 = vld [vmem:[#allocation2 + $0x78] sm:$0xff] }
  0x77   :  { %2481 = vmatpush3.bf16.msra.mxu1 %v2716_v39  ;;  %2460 = vmatprep.subr.bf16.mxu0 %v2717_v40  ;;  %v105_v39 = vpack.c.bf16 %v81_v37, %v57_v36  ;;  %v83_v40 = vld [vmem:[#allocation2 + $0x138] sm:$0xff]  ;;  %v2805_v36 = vld [vmem:[#allocation5 + $0x550] sm:$0xff]  }
  0x78   :  { %2482 = vmatprep.subr.bf16.mxu1 %v2718_v41  ;;  %v56_v41 = vld [vmem:[#allocation2 + $0x60] sm:$0xff]  ;;  %v2806_v37 = vld [vmem:[#allocation5 + $0x5d0] sm:$0xff]  }
  0x7a   :  { %2461 = vmatpush3.bf16.msra.mxu0 %v2719_v42  ;;  %v80_v42 = vld [vmem:[#allocation2 + $0x120] sm:$0xff] }
  0x7b   :  { %2483 = vmatpush3.bf16.msra.mxu1 %v2720_v43  ;;  %2462 = vmatprep.subr.bf16.mxu0 %v2721_v44  ;;  %v107_v43 = vpack.c.bf16 %v83_v40, %v59_v38  ;;  %v104_v44 = vpack.c.bf16 %v80_v42, %v56_v41  ;;  %v2807_v38 = vld [vmem:[#allocation5 + $0x510] sm:$0xff]   ;;  %v2809_v40 = vld [vmem:[#allocation5 + $0x558] sm:$0xff]  }
  0x7c   :  { %2484 = vmatprep.subr.bf16.mxu1 %v2722_v45  ;;  %v58_v45 = vld [vmem:[#allocation2 + $0x70] sm:$0xff]  ;;  %v2810_v41 = vld [vmem:[#allocation5 + $0x5d8] sm:$0xff]  }
  0x7d   :  { %v2811_v42 = vld [vmem:[#allocation5 + $0x518] sm:$0xff]  }
  0x7e   :  { %2463 = vmatpush3.bf16.msra.mxu0 %v2723_v46  ;;  %v82_v46 = vld [vmem:[#allocation2 + $0x130] sm:$0xff] }
  0x7f   :  { %2485 = vmatpush3.bf16.msra.mxu1 %v2724_v47  ;;  %2464 = vmatprep.subr.bf16.mxu0 %v2725_v48  ;;  %v106_v47 = vpack.c.bf16 %v82_v46, %v58_v45  ;;  %v2765_v48 = vld [vmem:[#allocation5 + $0x440] sm:$0xff]  }
  0x80   :  { %2486 = vmatprep.subr.bf16.mxu1 %v2726_v49  ;;  %v2766_v49 = vld [vmem:[#allocation5 + $0x4c0] sm:$0xff]  }
  0x81   :  { %v2814_v45 = vld [vmem:[#allocation5 + $0x5e0] sm:$0xff]  }
  0x82   :  { %2465 = vmatpush3.bf16.msra.mxu0 %v2727_v50  ;;  %v2767_v50 = vld [vmem:[#allocation5 + $0x400] sm:$0xff]  }
  0x83   :  { %2487 = vmatpush3.bf16.msra.mxu1 %v2728_v51  ;;  %2466 = vmatprep.subr.bf16.mxu0 %v2729_v52  ;;  %v2768_v51 = vld [vmem:[#allocation5 + $0x480] sm:$0xff]   ;;  %v2769_v52 = vld [vmem:[#allocation5 + $0x448] sm:$0xff]  }
  0x84   :  { %2488 = vmatprep.subr.bf16.mxu1 %v2730_v53  ;;  %v2770_v53 = vld [vmem:[#allocation5 + $0x4c8] sm:$0xff]   ;;  %v2815_v46 = vld [vmem:[#allocation5 + $0x520] sm:$0xff]  }
  0x86   :  { %2467 = vmatpush3.bf16.msra.mxu0 %v2731_v54  ;;  %v2771_v54 = vld [vmem:[#allocation5 + $0x408] sm:$0xff]  }
  0x87   :  { %2489 = vmatpush3.bf16.msra.mxu1 %v2732_v55  ;;  %2496 = vmatprep.subr.bf16.mxu0 %v2733_v4  ;;  %v2772_v55 = vld [vmem:[#allocation5 + $0x488] sm:$0xff]  }
  0x88   :  { %2518 = vmatprep.subr.bf16.mxu1 %v2734_v5  ;;  %v2785_v4 = vld [vmem:[#allocation5 + $0x468] sm:$0xff]  }
  0x89   :  { %1856 = vmatmul.mubr.bf16.vlgmr.msra.gmra.mrb[8].mxu0 %v100_v2  ;;  %v2783_v2 = vld [vmem:[#allocation5 + $0x420] sm:$0xff]   ;;  %v2786_v5 = vld [vmem:[#allocation5 + $0x4e8] sm:$0xff]  }
  0x8a   :  { %1897 = vmatmul.mubr.bf16.vlgmr.msra.gmra.mrb[8].mxu1 %v102_v3  ;;  %2497 = vmatpush3.bf16.msra.mxu0 %v2735_v6  ;;  %v2784_v3 = vld [vmem:[#allocation5 + $0x4a0] sm:$0xff]   ;;  %v2787_v6 = vld [vmem:[#allocation5 + $0x428] sm:$0xff]  }
  0x8b   :  { %2519 = vmatpush3.bf16.msra.mxu1 %v2736_v7  ;;  %2498 = vmatprep.subr.bf16.mxu0 %v2737_v8  ;;  %v2788_v7 = vld [vmem:[#allocation5 + $0x4a8] sm:$0xff]   ;;  %v2789_v8 = vld [vmem:[#allocation5 + $0x470] sm:$0xff]  }
  0x8c   :  { %2520 = vmatprep.subr.bf16.mxu1 %v2738_v9  ;;  %1937 = vmatprep.mubr.bf16.mxu0 %v105_v39  ;;  %v2790_v9 = vld [vmem:[#allocation5 + $0x4f0] sm:$0xff]  }
  0x8d   :  { %1978 = vmatprep.mubr.bf16.mxu1 %v107_v43  ;;  %v2808_v39 = vld [vmem:[#allocation5 + $0x590] sm:$0xff]   ;;  %v2812_v43 = vld [vmem:[#allocation5 + $0x598] sm:$0xff]  }
  0x8e   :  { %2499 = vmatpush3.bf16.msra.mxu0 %v2739_v10  ;;  %v2791_v10 = vld [vmem:[#allocation5 + $0x430] sm:$0xff]  }
  0x8f   :  { %2521 = vmatpush3.bf16.msra.mxu1 %v2740_v11  ;;  %2500 = vmatprep.subr.bf16.mxu0 %v2741_v12  ;;  %v2792_v11 = vld [vmem:[#allocation5 + $0x4b0] sm:$0xff]   ;;  %v2793_v12 = vld [vmem:[#allocation5 + $0x478] sm:$0xff]  }
  0x90   :  { %2522 = vmatprep.subr.bf16.mxu1 %v2742_v13  ;;  %v2794_v13 = vld [vmem:[#allocation5 + $0x4f8] sm:$0xff]  }
  0x92   :  { %2501 = vmatpush3.bf16.msra.mxu0 %v2743_v14  ;;  %v2795_v14 = vld [vmem:[#allocation5 + $0x438] sm:$0xff]  }
  0x93   :  { %2523 = vmatpush3.bf16.msra.mxu1 %v2744_v15  ;;  %2502 = vmatprep.subr.bf16.mxu0 %v2745_v16  ;;  %v2796_v15 = vld [vmem:[#allocation5 + $0x4b8] sm:$0xff]   ;;  %v61_v16 = vld [vmem:[#allocation2 + $0x88] sm:$0xff] }
  0x94   :  { %2524 = vmatprep.subr.bf16.mxu1 %v2746_v17  ;;  %v85_v17 = vld [vmem:[#allocation2 + $0x148] sm:$0xff] }
  0x96   :  { %2503 = vmatpush3.bf16.msra.mxu0 %v2747_v18  ;;  %v63_v18 = vld [vmem:[#allocation2 + $0x98] sm:$0xff] }
  0x97   :  { %2525 = vmatpush3.bf16.msra.mxu1 %v2748_v19  ;;  %2504 = vmatprep.subr.bf16.mxu0 %v2749_v20  ;;  %v87_v19 = vld [vmem:[#allocation2 + $0x158] sm:$0xff]  ;;  %v109_v20 = vpack.c.bf16 %v85_v17, %v61_v16 }
  0x98   :  { %2526 = vmatprep.subr.bf16.mxu1 %v2750_v21  ;;  %v111_v21 = vpack.c.bf16 %v87_v19, %v63_v18 }
  0x9a   :  { %2505 = vmatpush3.bf16.msra.mxu0 %v2751_v22  ;;  %v60_v22 = vld [vmem:[#allocation2 + $0x80] sm:$0xff] }
  0x9b   :  { %2527 = vmatpush3.bf16.msra.mxu1 %v2752_v23  ;;  %2506 = vmatprep.subr.bf16.mxu0 %v2753_v24  ;;  %v84_v23 = vld [vmem:[#allocation2 + $0x140] sm:$0xff]  ;;  %v62_v24 = vld [vmem:[#allocation2 + $0x90] sm:$0xff] }
  0x9c   :  { %2528 = vmatprep.subr.bf16.mxu1 %v2754_v25  ;;  %v108_v25 = vpack.c.bf16 %v84_v23, %v60_v22 }
  0x9e   :  { %2507 = vmatpush3.bf16.msra.mxu0 %v2755_v26  ;;  %v86_v26 = vld [vmem:[#allocation2 + $0x150] sm:$0xff] }
  0x9f   :  { %2529 = vmatpush3.bf16.msra.mxu1 %v2756_v27  ;;  %2508 = vmatprep.subr.bf16.mxu0 %v2757_v28  ;;  %v110_v27 = vpack.c.bf16 %v86_v26, %v62_v24  ;;  %v2797_v28 = vld [vmem:[#allocation5 + $0x540] sm:$0xff]  }
  0xa0   :  { %2530 = vmatprep.subr.bf16.mxu1 %v2758_v29  ;;  %v2798_v29 = vld [vmem:[#allocation5 + $0x5c0] sm:$0xff]  }
  0xa2   :  { %2509 = vmatpush3.bf16.msra.mxu0 %v2759_v30  ;;  %v2799_v30 = vld [vmem:[#allocation5 + $0x500] sm:$0xff]  }
  0xa3   :  { %2531 = vmatpush3.bf16.msra.mxu1 %v2760_v31  ;;  %2510 = vmatprep.subr.bf16.mxu0 %v2761_v32  ;;  %v2800_v31 = vld [vmem:[#allocation5 + $0x580] sm:$0xff]   ;;  %v2801_v32 = vld [vmem:[#allocation5 + $0x548] sm:$0xff]  }
  0xa4   :  { %2532 = vmatprep.subr.bf16.mxu1 %v2762_v33  ;;  %v2802_v33 = vld [vmem:[#allocation5 + $0x5c8] sm:$0xff]  }
  0xa6   :  { %2511 = vmatpush3.bf16.msra.mxu0 %v2763_v34  ;;  %v2803_v34 = vld [vmem:[#allocation5 + $0x508] sm:$0xff]  }
  0xa7   :  { %2533 = vmatpush3.bf16.msra.mxu1 %v2764_v35  ;;  %2540 = vmatprep.subr.bf16.mxu0 %v2765_v48  ;;  %v2804_v35 = vld [vmem:[#allocation5 + $0x588] sm:$0xff]  }
  0xa8   :  { %2562 = vmatprep.subr.bf16.mxu1 %v2766_v49  ;;  %v2817_v48 = vld [vmem:[#allocation5 + $0x568] sm:$0xff]  }
  0xa9   :  { %1938 = vmatmul.mubr.bf16.vlgmr.msra.gmra.mrb[12].mxu0 %v104_v44  ;;  %v2813_v44 = vld [vmem:[#allocation5 + $0x560] sm:$0xff]   ;;  %v2818_v49 = vld [vmem:[#allocation5 + $0x5e8] sm:$0xff]  }
  0xaa   :  { %1979 = vmatmul.mubr.bf16.vlgmr.msra.gmra.mrb[12].mxu1 %v106_v47  ;;  %2541 = vmatpush3.bf16.msra.mxu0 %v2767_v50  ;;  %v2816_v47 = vld [vmem:[#allocation5 + $0x5a0] sm:$0xff]   ;;  %v2819_v50 = vld [vmem:[#allocation5 + $0x528] sm:$0xff]  }
  0xab   :  { %2563 = vmatpush3.bf16.msra.mxu1 %v2768_v51  ;;  %2542 = vmatprep.subr.bf16.mxu0 %v2769_v52  ;;  %v2820_v51 = vld [vmem:[#allocation5 + $0x5a8] sm:$0xff]   ;;  %v2821_v52 = vld [vmem:[#allocation5 + $0x570] sm:$0xff]  }
  0xac   :  { %2564 = vmatprep.subr.bf16.mxu1 %v2770_v53  ;;  %2019 = vmatprep.mubr.bf16.mxu0 %v109_v20  ;;  %v2822_v53 = vld [vmem:[#allocation5 + $0x5f0] sm:$0xff]  }
  0xad   :  { %2060 = vmatprep.mubr.bf16.mxu1 %v111_v21 }
  0xae   :  { %2543 = vmatpush3.bf16.msra.mxu0 %v2771_v54  ;;  %v2823_v54 = vld [vmem:[#allocation5 + $0x530] sm:$0xff]  }
  0xaf   :  { %2565 = vmatpush3.bf16.msra.mxu1 %v2772_v55  ;;  %2544 = vmatprep.subr.bf16.mxu0 %v2773_v56  ;;  %v2824_v55 = vld [vmem:[#allocation5 + $0x5b0] sm:$0xff]   ;;  %v2825_v56 = vld [vmem:[#allocation5 + $0x578] sm:$0xff]  }
  0xb0   :  { %2566 = vmatprep.subr.bf16.mxu1 %v2774_v57  ;;  %v2826_v57 = vld [vmem:[#allocation5 + $0x5f8] sm:$0xff]  }
  0xb2   :  { %2545 = vmatpush3.bf16.msra.mxu0 %v2775_v58  ;;  %v2827_v58 = vld [vmem:[#allocation5 + $0x538] sm:$0xff]  }
  0xb3   :  { %2567 = vmatpush3.bf16.msra.mxu1 %v2776_v59  ;;  %2546 = vmatprep.subr.bf16.mxu0 %v2777_v60  ;;  %v2828_v59 = vld [vmem:[#allocation5 + $0x5b8] sm:$0xff]   ;;  %v65_v60 = vld [vmem:[#allocation2 + $0xa8] sm:$0xff] }
  0xb4   :  { %2568 = vmatprep.subr.bf16.mxu1 %v2778_v61  ;;  %v89_v61 = vld [vmem:[#allocation2 + $0x168] sm:$0xff] }
  0xb6   :  { %2547 = vmatpush3.bf16.msra.mxu0 %v2779_v62  ;;  %v113_v62 = vpack.c.bf16 %v89_v61, %v65_v60 }
  0xb7   :  { %2569 = vmatpush3.bf16.msra.mxu1 %v2780_v63  ;;  %2548 = vmatprep.subr.bf16.mxu0 %v2781_v0  ;;  %v67_v63 = vld [vmem:[#allocation2 + $0xb8] sm:$0xff] }
  0xb8   :  { %2570 = vmatprep.subr.bf16.mxu1 %v2782_v1  ;;  %v91_v0 = vld [vmem:[#allocation2 + $0x178] sm:$0xff]  ;;  %v64_v1 = vld [vmem:[#allocation2 + $0xa0] sm:$0xff] }
  0xba   :  { %2549 = vmatpush3.bf16.msra.mxu0 %v2783_v2  ;;  %v115_v2 = vpack.c.bf16 %v91_v0, %v67_v63 }
  0xbb   :  { %2571 = vmatpush3.bf16.msra.mxu1 %v2784_v3  ;;  %2550 = vmatprep.subr.bf16.mxu0 %v2785_v4  ;;  %v88_v3 = vld [vmem:[#allocation2 + $0x160] sm:$0xff]  ;;  %v66_v4 = vld [vmem:[#allocation2 + $0xb0] sm:$0xff] }
  0xbc   :  { %2572 = vmatprep.subr.bf16.mxu1 %v2786_v5  ;;  %v90_v5 = vld [vmem:[#allocation2 + $0x170] sm:$0xff] }
  0xbe   :  { %2551 = vmatpush3.bf16.msra.mxu0 %v2787_v6  ;;  %v112_v6 = vpack.c.bf16 %v88_v3, %v64_v1 }
  0xbf   :  { %2573 = vmatpush3.bf16.msra.mxu1 %v2788_v7  ;;  %2552 = vmatprep.subr.bf16.mxu0 %v2789_v8  ;;  %v114_v7 = vpack.c.bf16 %v90_v5, %v66_v4 }
  0xc0   :  { %2574 = vmatprep.subr.bf16.mxu1 %v2790_v9 }
  0xc2   :  { %2553 = vmatpush3.bf16.msra.mxu0 %v2791_v10  ;;  %v2171_v10 = vld [vmem:[%s2971_s2] ss:$0 sm:$0xff]  ;;  %s2907_s2 = smov [#allocation7]  }
  0xc3   :  { %2575 = vmatpush3.bf16.msra.mxu1 %v2792_v11  ;;  %2554 = vmatprep.subr.bf16.mxu0 %v2793_v12  ;;  %s2158_s13 = sshll.u32 %s2907_s2, 4  ;;  %s2159_s13 = int_to_ptr.vmem [resolvable:$true] %s2158_s13 }
  0xc4   :  { %2576 = vmatprep.subr.bf16.mxu1 %v2794_v13  ;;  %s2873_s14 = scalar_lea.vmem %s2159_s13, 256  ;;  %p2878_p3 = scmp.lt.s32.totalorder %s2159_s13, %s2159_s13 }
  0xc5   :  { %p2874_p2 = scmp.ne.s32.totalorder %s2159_s13, %s2873_s14  ;;  %p2879_p4 = scmp.lt.s32.totalorder %s2873_s14, %s2873_s14 }
  0xc6   :  { %2555 = vmatpush3.bf16.msra.mxu0 %v2795_v14 }
  0xc7   :  { %2577 = vmatpush3.bf16.msra.mxu1 %v2796_v15  ;;  %2584 = vmatprep.subr.bf16.mxu0 %v2797_v28  ;;  %p2880_p5 = por %p2879_p4, %p2878_p3 }
  0xc8   :  { %2606 = vmatprep.subr.bf16.mxu1 %v2798_v29 }
  0xc9   :  { %2020 = vmatmul.mubr.bf16.vlgmr.msra.gmra.mrb[16].mxu0 %v108_v25  ;;  %p2881_p6 = pnand %p2880_p5, %p2874_p2 }
  0xca   :  { %2061 = vmatmul.mubr.bf16.vlgmr.msra.gmra.mrb[16].mxu1 %v110_v27  ;;  %2585 = vmatpush3.bf16.msra.mxu0 %v2799_v30 }
  0xcb   :  { %2607 = vmatpush3.bf16.msra.mxu1 %v2800_v31  ;;  %2586 = vmatprep.subr.bf16.mxu0 %v2801_v32 }
  0xcc   :  { %2608 = vmatprep.subr.bf16.mxu1 %v2802_v33  ;;  %2101 = vmatprep.mubr.bf16.mxu0 %v113_v62 }
  0xcd   :  { %2142 = vmatprep.mubr.bf16.mxu1 %v115_v2 }
  0xce   :  { %2587 = vmatpush3.bf16.msra.mxu0 %v2803_v34 }
  0xcf   :  { %2609 = vmatpush3.bf16.msra.mxu1 %v2804_v35  ;;  %2588 = vmatprep.subr.bf16.mxu0 %v2805_v36 }
  0xd0   :  { %2610 = vmatprep.subr.bf16.mxu1 %v2806_v37 }
  0xd2   :  { %2589 = vmatpush3.bf16.msra.mxu0 %v2807_v38 }
  0xd3   :  { %2611 = vmatpush3.bf16.msra.mxu1 %v2808_v39  ;;  %2590 = vmatprep.subr.bf16.mxu0 %v2809_v40 }
  0xd4   :  { %2612 = vmatprep.subr.bf16.mxu1 %v2810_v41 }
  0xd6   :  { %2591 = vmatpush3.bf16.msra.mxu0 %v2811_v42 }
  0xd7   :  { %2613 = vmatpush3.bf16.msra.mxu1 %v2812_v43  ;;  %2592 = vmatprep.subr.bf16.mxu0 %v2813_v44 }
  0xd8   :  { %2614 = vmatprep.subr.bf16.mxu1 %v2814_v45 }
  0xda   :  { %2593 = vmatpush3.bf16.msra.mxu0 %v2815_v46 }
  0xdb   :  { %2615 = vmatpush3.bf16.msra.mxu1 %v2816_v47  ;;  %2594 = vmatprep.subr.bf16.mxu0 %v2817_v48 }
  0xdc   :  { %2616 = vmatprep.subr.bf16.mxu1 %v2818_v49 }
  0xde   :  { %2595 = vmatpush3.bf16.msra.mxu0 %v2819_v50 }
  0xdf   :  { %2617 = vmatpush3.bf16.msra.mxu1 %v2820_v51  ;;  %2596 = vmatprep.subr.bf16.mxu0 %v2821_v52 }
  0xe0   :  { %2618 = vmatprep.subr.bf16.mxu1 %v2822_v53 }
  0xe2   :  { %2597 = vmatpush3.bf16.msra.mxu0 %v2823_v54 }
  0xe3   :  { %2619 = vmatpush3.bf16.msra.mxu1 %v2824_v55  ;;  %2598 = vmatprep.subr.bf16.mxu0 %v2825_v56 }
  0xe4   :  { %2620 = vmatprep.subr.bf16.mxu1 %v2826_v57 }
  0xe6   :  { %2599 = vmatpush3.bf16.msra.mxu0 %v2827_v58 }
  0xe7   :  { %2621 = vmatpush3.bf16.msra.mxu1 %v2828_v59 }
  0xe9   :  { %2102 = vmatmul.mubr.bf16.vlgmr.msra.gmra.mrb[20].mxu0 %v112_v6 }
  0xea   :  { %2143 = vmatmul.mubr.bf16.vlgmr.msra.gmra.mrb[20].mxu1 %v114_v7 }
 0x11c   :  { %v2380_v8 = vpop.f32.mrb[0].mxu0 }
 0x11d   :  { %v2402_v9 = vpop.f32.mrb[0].mxu1  ;;  %v2381_v11 = vpop.f32.mrb[1].mxu0 }
 0x11e   :  { %v2382_v12 = vadd.f32 %v2381_v11, %v2380_v8  ;;  %v2403_v13 = vpop.f32.mrb[1].mxu1  ;;  %v2383_v14 = vpop.f32.mrb[2].mxu0 }
 0x11f   :  { %v2404_v15 = vadd.f32 %v2403_v13, %v2402_v9  ;;  %v2405_v16 = vpop.f32.mrb[2].mxu1  ;;  %v2384_v17 = vpop.f32.mrb[3].mxu0 }
 0x120   :  { %v1694_v18 = vadd.f32 %v2382_v12, %v2171_v10  ;;  %v2385_v19 = vadd.f32 %v2384_v17, %v2383_v14  ;;  %v2406_v20 = vpop.f32.mrb[3].mxu1 }
 0x121   :  { %v2407_v21 = vadd.f32 %v2406_v20, %v2405_v16 }
 0x122   :  { %v1735_v22 = vadd.f32 %v2404_v15, %v1694_v18  ;;  %v1697_v23 = vadd.f32 %v2385_v19, %v2171_v10 }
 0x124   :  { %v1738_v24 = vadd.f32 %v2407_v21, %v1697_v23 }
 0x13c   :  { %v2424_v25 = vpop.f32.mrb[4].mxu0 }
 0x13d   :  { %v2446_v26 = vpop.f32.mrb[4].mxu1  ;;  %v2425_v27 = vpop.f32.mrb[5].mxu0 }
 0x13e   :  { %v2426_v28 = vadd.f32 %v2425_v27, %v2424_v25  ;;  %v2447_v29 = vpop.f32.mrb[5].mxu1  ;;  %v2427_v30 = vpop.f32.mrb[6].mxu0 }
 0x13f   :  { %v2448_v31 = vadd.f32 %v2447_v29, %v2446_v26  ;;  %v2449_v32 = vpop.f32.mrb[6].mxu1  ;;  %v2428_v33 = vpop.f32.mrb[7].mxu0 }
 0x140   :  { %v1776_v34 = vadd.f32 %v2426_v28, %v1735_v22  ;;  %v2429_v35 = vadd.f32 %v2428_v33, %v2427_v30  ;;  %v2450_v36 = vpop.f32.mrb[7].mxu1 }
 0x141   :  { %v2451_v37 = vadd.f32 %v2450_v36, %v2449_v32 }
 0x142   :  { %v1817_v38 = vadd.f32 %v2448_v31, %v1776_v34  ;;  %v1779_v39 = vadd.f32 %v2429_v35, %v1738_v24 }
 0x144   :  { %v1820_v40 = vadd.f32 %v2451_v37, %v1779_v39 }
 0x15c   :  { %v2468_v41 = vpop.f32.mrb[8].mxu0 }
 0x15d   :  { %v2490_v42 = vpop.f32.mrb[8].mxu1  ;;  %v2469_v43 = vpop.f32.mrb[9].mxu0 }
 0x15e   :  { %v2491_v44 = vpop.f32.mrb[9].mxu1  ;;  %v2470_v45 = vadd.f32 %v2469_v43, %v2468_v41  ;;  %v2471_v47 = vpop.f32.mrb[10].mxu0 }
 0x15f   :  { %v2492_v46 = vadd.f32 %v2491_v44, %v2490_v42  ;;  %v2493_v48 = vpop.f32.mrb[10].mxu1  ;;  %v2472_v49 = vpop.f32.mrb[11].mxu0 }
 0x160   :  { %v2494_v50 = vpop.f32.mrb[11].mxu1  ;;  %v1858_v51 = vadd.f32 %v2470_v45, %v1817_v38  ;;  %v2473_v52 = vadd.f32 %v2472_v49, %v2471_v47 }
 0x161   :  { %v2495_v53 = vadd.f32 %v2494_v50, %v2493_v48 }
 0x162   :  { %v1899_v54 = vadd.f32 %v2492_v46, %v1858_v51  ;;  %v1861_v55 = vadd.f32 %v2473_v52, %v1820_v40 }
 0x164   :  { %v1902_v56 = vadd.f32 %v2495_v53, %v1861_v55 }
 0x17c   :  { %v2512_v57 = vpop.f32.mrb[12].mxu0 }
 0x17d   :  { %v2534_v58 = vpop.f32.mrb[12].mxu1  ;;  %v2513_v59 = vpop.f32.mrb[13].mxu0 }
 0x17e   :  { %v2514_v60 = vadd.f32 %v2513_v59, %v2512_v57  ;;  %v2535_v61 = vpop.f32.mrb[13].mxu1  ;;  %v2515_v62 = vpop.f32.mrb[14].mxu0 }
 0x17f   :  { %v2536_v63 = vadd.f32 %v2535_v61, %v2534_v58  ;;  %v2537_v0 = vpop.f32.mrb[14].mxu1  ;;  %v2516_v1 = vpop.f32.mrb[15].mxu0 }
 0x180   :  { %v1940_v2 = vadd.f32 %v2514_v60, %v1899_v54  ;;  %v2517_v3 = vadd.f32 %v2516_v1, %v2515_v62  ;;  %v2538_v4 = vpop.f32.mrb[15].mxu1 }
 0x181   :  { %v2539_v5 = vadd.f32 %v2538_v4, %v2537_v0 }
 0x182   :  { %v1981_v6 = vadd.f32 %v2536_v63, %v1940_v2  ;;  %v1943_v7 = vadd.f32 %v2517_v3, %v1902_v56 }
 0x184   :  { %v1984_v8 = vadd.f32 %v2539_v5, %v1943_v7 }
 0x19c   :  { %v2556_v9 = vpop.f32.mrb[16].mxu0 }
 0x19d   :  { %v2578_v10 = vpop.f32.mrb[16].mxu1  ;;  %v2557_v11 = vpop.f32.mrb[17].mxu0 }
 0x19e   :  { %v2558_v12 = vadd.f32 %v2557_v11, %v2556_v9  ;;  %v2579_v13 = vpop.f32.mrb[17].mxu1  ;;  %v2559_v14 = vpop.f32.mrb[18].mxu0 }
 0x19f   :  { %v2580_v15 = vadd.f32 %v2579_v13, %v2578_v10  ;;  %v2581_v16 = vpop.f32.mrb[18].mxu1  ;;  %v2560_v17 = vpop.f32.mrb[19].mxu0 }
 0x1a0   :  { %v2022_v18 = vadd.f32 %v2558_v12, %v1981_v6  ;;  %v2561_v19 = vadd.f32 %v2560_v17, %v2559_v14  ;;  %v2582_v20 = vpop.f32.mrb[19].mxu1 }
 0x1a1   :  { %v2583_v21 = vadd.f32 %v2582_v20, %v2581_v16 }
 0x1a2   :  { %v2063_v22 = vadd.f32 %v2580_v15, %v2022_v18  ;;  %v2025_v23 = vadd.f32 %v2561_v19, %v1984_v8 }
 0x1a4   :  { %v2066_v24 = vadd.f32 %v2583_v21, %v2025_v23 }
 0x1bc   :  { %v2600_v25 = vpop.f32.mrb[20].mxu0 }
 0x1bd   :  { %v2622_v26 = vpop.f32.mrb[20].mxu1  ;;  %v2601_v27 = vpop.f32.mrb[21].mxu0 }
 0x1be   :  { %v2623_v28 = vpop.f32.mrb[21].mxu1  ;;  %v2602_v29 = vadd.f32 %v2601_v27, %v2600_v25  ;;  %v2603_v31 = vpop.f32.mrb[22].mxu0 }
 0x1bf   :  { %v2624_v30 = vadd.f32 %v2623_v28, %v2622_v26  ;;  %v2625_v32 = vpop.f32.mrb[22].mxu1  ;;  %v2604_v33 = vpop.f32.mrb[23].mxu0 }
 0x1c0   :  { %v2626_v34 = vpop.f32.mrb[23].mxu1  ;;  %v2104_v35 = vadd.f32 %v2602_v29, %v2063_v22  ;;  %v2605_v36 = vadd.f32 %v2604_v33, %v2603_v31 }
 0x1c1   :  { %v2627_v37 = vadd.f32 %v2626_v34, %v2625_v32 }
 0x1c2   :  { %v2145_v38 = vadd.f32 %v2624_v30, %v2104_v35  ;;  %v2107_v39 = vadd.f32 %v2605_v36, %v2066_v24 }
 0x1c4   :  { %2151 = vst [vmem:[#allocation7] sm:$0xff] %v2145_v38  ;;  %v2148_v40 = vadd.f32 %v2627_v37, %v2107_v39 }
 0x1c6   :  { %2152 = vst [vmem:[#allocation7 + $0x8] sm:$0xff] %v2148_v40 }
 0x1c7   :  { %2884 = shalt.err (!%p2881_p6)
}
 0x1c8   :  { %s2885_s17 = scalar_lea.hbm %s2972_s3, 256 }
 0x1c9   :  { %p2886_p7 = scmp.ne.s32.totalorder %s2972_s3, %s2885_s17  ;;  %p2889_p8 = scmp.lt.u32.totalorder %s2885_s17, %s2972_s3 }
 0x1cb   :  { %p2891_p9 = pnand %p2889_p8, %p2886_p7 }
 0x1cd   :  { %2894 = shalt.err (!%p2891_p9)
}
 0x1ce   :  { %s2908_s22 = smov 128   ;;  %s2909_s23 = smov 8  }
 0x1cf   :  { %2164 = dma.vmem_to_hbm [thread:$0]  %s2159_s13, 256, %s2972_s3, [#allocation4], %s2908_s22, %s2908_s22, %s2909_s23  }
 0x1d0   :  { %2899 = dma.done.wait [#allocation4], 256  }
 0x1d1   :  { %2900 = vsyncadd [#allocation4], 4294967040 }
 0x1d2   :  { %2168 = vsyncpa [#allocation3], 1 }
 0x1d3   :  { %2169 = vsyncpa [#allocation6], 1 }
 0x1d4   :  { %2170 = vsyncpa [#allocation4], 1 }

</bundles_post_ra>
